<compile_context>
chip_gen: v7x
topology: tpu7x:2x2x1
jax: 0.10.0
libtpu: 0.0.40
codegen_flags: <defaults>
</compile_context>

<pallas_src>
import functools

import jax
import jax.numpy as jnp
from jax import lax
from jax.experimental import pallas as pl
from jax.experimental.pallas import tpu as pltpu


_NT_DIMS = (((1,), (1,)), ((), ()))   # A(m,k) @ B(n,k)^T -> (m, n)
_TN_DIMS = (((0,), (0,)), ((), ()))   # A(k,m)^T @ B(k,n) -> (m, n)


def _proto_attention_kernel(*refs, gumbel, hard, inv_tau):
    if gumbel:
        x_ref, p_ref, g_ref, o_ref = refs
    else:
        x_ref, p_ref, o_ref = refs
        g_ref = None

    x = x_ref[0]                       # (TILE_N, D)
    protos = p_ref[...]                # (P, D)
    num_p = protos.shape[0]

    # Logits in lane-dense (P, TILE_N) orientation (token axis on the lanes).
    # This is exactly `prototypes @ x^T` per batch; PyTorch's softmax dim=1
    # (the prototype axis) is axis 0 here.
    logits = lax.dot_general(protos, x, _NT_DIMS,
                             preferred_element_type=jnp.float32)

    if gumbel:
        # (logits + Gumbel noise) * (1/tau): divide folded into a multiply.
        logits = (logits + g_ref[0].astype(jnp.float32)) * inv_tau

    if hard:
        # Straight-through *forward* value: one-hot of the (first) argmax over
        # prototypes.  argmax(softmax(z)) == argmax(z), so the softmax itself
        # (exp / sum / divide) is dead work and skipped.
        # TODO(synk): straight-through backward (custom_vjp) not implemented;
        # this kernel is forward-only.
        m = jnp.max(logits, axis=0, keepdims=True)                   # (1, T)
        iota = lax.broadcasted_iota(jnp.int32, logits.shape, 0)      # (P, T)
        first = jnp.min(jnp.where(logits >= m, iota, num_p), axis=0,
                        keepdims=True)                               # (1, T)
        attn = (iota == first).astype(jnp.float32)                   # (P, T)
    else:
        m = jnp.max(logits, axis=0, keepdims=True)                   # (1, T)
        e = jnp.exp(logits - m)                                      # (P, T)
        denom = jnp.sum(e, axis=0, keepdims=True)                    # (1, T)
        # One divide per token (instead of P), the rest are multiplies.
        attn = e * (1.0 / denom)

    # out (TILE_N, D) = attn^T @ prototypes   (transposed-LHS MXU matmul);
    # matches `attn.transpose(-2, -1) @ prototypes` per batch.
    out = lax.dot_general(attn, protos, _TN_DIMS,
                          preferred_element_type=jnp.float32)
    o_ref[0] = out.astype(o_ref.dtype)


def _round_up(x, m):
    return (x + m - 1) // m * m


def _pick_tile_n(d, p):
    """Token-tile size whose double-buffered working set stays well under the
    smallest default scoped-VMEM limit across TPU generations (v5e: 16 MiB,
    v6e: 32 MiB, v7x: 32 MiB scoped of 64 MiB physical)."""
    budget = 12 * 1024 * 1024
    # f32 bytes per token: x row + out row (x2 double-buffer each), gumbel
    # column (x2), plus ~4 (P,)-sized live intermediates (logits/exp/attn).
    per_tok = 4 * (2 * 2 * d + 2 * p + 4 * p)
    fixed = 2 * 4 * p * d + (1 << 20)      # prototypes (dbl-buffered) + slack
    tile = 1024                            # target 512-1024 rows per grid step
    while tile > 128 and tile * per_tok + fixed > budget:
        tile //= 2
    return tile                            # always a multiple of 128


def proto_attention(x, prototypes, key=None, *, temperature=1.0, hard=False,
                    gumbel=True):
    """Pallas implementation of ProtoAttention.forward (return_attn=False)."""
    B, N, D = x.shape
    P, Dp = prototypes.shape
    assert D == Dp, "feature dims of x and prototypes must match"

    tile = _pick_tile_n(D, P)
    if N <= tile:
        tile_n = _round_up(N, 8)           # single tile per batch, f32 sublane
        n_pad = tile_n
    else:
        tile_n = tile                      # multiple of 128 (lane-aligned)
        n_pad = _round_up(N, tile_n)

    x_p = x if n_pad == N else jnp.pad(x, ((0, 0), (0, n_pad - N), (0, 0)))

    operands = [x_p, prototypes]
    in_specs = [
        pl.BlockSpec((1, tile_n, D), lambda b, i: (b, i, 0)),
        pl.BlockSpec((P, D), lambda b, i: (0, 0)),
    ]
    if gumbel:
        if key is None:
            key = jax.random.PRNGKey(0)
        # Gumbel(0,1) noise, same distribution as torch.nn.functional.gumbel_softmax.
        noise = jax.random.gumbel(key, (B, P, N), dtype=jnp.float32)
        if n_pad != N:
            noise = jnp.pad(noise, ((0, 0), (0, 0), (0, n_pad - N)))
        operands.append(noise)
        in_specs.append(pl.BlockSpec((1, P, tile_n), lambda b, i: (b, 0, i)))

    kernel = functools.partial(
        _proto_attention_kernel,
        gumbel=bool(gumbel), hard=bool(hard),
        inv_tau=float(1.0 / temperature))

    out = pl.pallas_call(
        kernel,
        out_shape=jax.ShapeDtypeStruct((B, n_pad, D), x.dtype),
        grid=(B, n_pad // tile_n),
        in_specs=in_specs,
        out_specs=pl.BlockSpec((1, tile_n, D), lambda b, i: (b, i, 0)),
        compiler_params=pltpu.CompilerParams(
            dimension_semantics=("parallel", "parallel")),
    )(*operands)

    return out if n_pad == N else out[:, :N, :]


if __name__ == "__main__":
    root = jax.random.PRNGKey(0)
    kx, kp, kn, kx2, kp2, kn2 = jax.random.split(root, 6)

    hi = lax.Precision.HIGHEST

    def reference(x, protos, noise=None, tau=1.0, hard=False):
        attn = jnp.einsum("pd,bnd->bpn", protos, x, precision=hi)
        if noise is not None:
            attn = (attn + noise) / tau
        soft = jax.nn.softmax(attn, axis=1)
        if hard:
            idx = jnp.argmax(soft, axis=1)                           # (B, N)
            attn = jax.nn.one_hot(idx, protos.shape[0], axis=1)      # (B, P, N)
        else:
            attn = soft
        return jnp.einsum("bpn,pd->bnd", attn, protos, precision=hi)

    # Small shapes consistent with the module: batch=2, tokens=8, dim=32, P=8.
    B, N, D, P = 2, 8, 32, 8
    x = jax.random.normal(kx, (B, N, D), dtype=jnp.float32)
    prototypes = jax.random.uniform(kp, (P, D), dtype=jnp.float32)   # torch.rand init

    # 1) Default module config: gumbel=True, temperature=1, hard=False.
    out = proto_attention(x, prototypes, kn, temperature=1.0, hard=False,
                          gumbel=True)
    jax.block_until_ready(out)
    assert out.shape == (B, N, D) and out.dtype == jnp.float32
    noise = jax.random.gumbel(kn, (B, P, N), dtype=jnp.float32)
    assert jnp.allclose(out, reference(x, prototypes, noise=noise, tau=1.0),
                        rtol=1e-3, atol=1e-3)

    # 2) Deterministic soft path (gumbel=False, hard=False) vs plain JAX.
    out_soft = proto_attention(x, prototypes, gumbel=False, hard=False)
    assert jnp.allclose(out_soft, reference(x, prototypes), rtol=1e-3, atol=1e-3)

    # 3) Hard (straight-through) forward: every output token must be one of the
    #    prototype rows (one-hot mixture), regardless of argmax tie-breaking.
    out_hard = proto_attention(x, prototypes, kn, gumbel=True, hard=True)
    jax.block_until_ready(out_hard)
    d2 = jnp.min(jnp.sum((out_hard[:, :, None, :] - prototypes[None, None]) ** 2,
                         axis=-1), axis=-1)
    assert out_hard.shape == (B, N, D) and bool(jnp.all(d2 < 1e-4))

    # 4) A case that exercises token tiling + padding (N > tile, N % tile != 0).
    B2, N2, D2, P2 = 1, 2500, 32, 8
    x2 = jax.random.normal(kx2, (B2, N2, D2), dtype=jnp.float32)
    protos2 = jax.random.uniform(kp2, (P2, D2), dtype=jnp.float32)
    out2 = proto_attention(x2, protos2, kn2, temperature=0.7, hard=False,
                           gumbel=True)
    noise2 = jax.random.gumbel(kn2, (B2, P2, N2), dtype=jnp.float32)
    assert jnp.allclose(out2, reference(x2, protos2, noise=noise2, tau=0.7),
                        rtol=1e-3, atol=1e-3)

    print("KERNEL_OK")
</pallas_src>

<mosaic_0001>
module attributes {stable_mosaic.version = 11 : i64} {
  func.func @_proto_attention_kernel(%arg0: i32, %arg1: i32, %arg2: memref<1x8x32xf32, #tpu.memory_space<vmem>>, %arg3: memref<8x32xf32, #tpu.memory_space<vmem>>, %arg4: memref<1x8x8xf32, #tpu.memory_space<vmem>>, %arg5: memref<1x8x32xf32, #tpu.memory_space<vmem>>) attributes {dimension_semantics = [#tpu.dimension_semantics<parallel>, #tpu.dimension_semantics<parallel>], iteration_bounds = array<i64: 2, 1>, scalar_prefetch = 0 : i64, scratch_operands = 0 : i64, tpu.core_type = #tpu.core_type<tc>, window_params = [{transform_indices = @transform_0, window_bounds = array<i64: 1, 8, 32>}, {pipeline_mode = #tpu.pipeline_mode<synchronous>, transform_indices = @transform_1, window_bounds = array<i64: 8, 32>}, {transform_indices = @transform_2, window_bounds = array<i64: 1, 8, 8>}, {transform_indices = @transform_3, window_bounds = array<i64: 1, 8, 32>}]} {
    %c0 = arith.constant 0 : index
    %c0_0 = arith.constant 0 : index
    %c0_1 = arith.constant 0 : index
    %0 = vector.load %arg2[%c0, %c0_0, %c0_1] : memref<1x8x32xf32, #tpu.memory_space<vmem>>, vector<1x8x32xf32>
    %1 = vector.shape_cast %0 : vector<1x8x32xf32> to vector<8x32xf32>
    %c0_2 = arith.constant 0 : index
    %c0_3 = arith.constant 0 : index
    %2 = vector.load %arg3[%c0_2, %c0_3] : memref<8x32xf32, #tpu.memory_space<vmem>>, vector<8x32xf32>
    %cst = arith.constant dense<0.000000e+00> : vector<8x8xf32>
    %3 = tpu.matmul %2, %1, %cst {dimension_numbers = #tpu.dot_dimension_numbers<[1], [1], [0], [0], [0, 0, 1, 0], [], []>} : vector<8x32xf32>, vector<8x32xf32>, vector<8x8xf32> -> vector<8x8xf32>
    %c0_4 = arith.constant 0 : index
    %c0_5 = arith.constant 0 : index
    %c0_6 = arith.constant 0 : index
    %4 = vector.load %arg4[%c0_4, %c0_5, %c0_6] : memref<1x8x8xf32, #tpu.memory_space<vmem>>, vector<1x8x8xf32>
    %5 = vector.shape_cast %4 : vector<1x8x8xf32> to vector<8x8xf32>
    %6 = arith.addf %3, %5 : vector<8x8xf32>
    %cst_7 = arith.constant 1.000000e+00 : f32
    %7 = vector.broadcast %cst_7 : f32 to vector<8x8xf32>
    %8 = arith.mulf %6, %7 : vector<8x8xf32>
    %cst_8 = arith.constant dense<0xFF800000> : vector<8xf32>
    %9 = vector.multi_reduction <maximumf>, %8, %cst_8 [0] : vector<8x8xf32> to vector<8xf32>
    %10 = vector.shape_cast %9 : vector<8xf32> to vector<1x8xf32>
    %11 = vector.broadcast %10 : vector<1x8xf32> to vector<8x8xf32>
    %12 = arith.subf %8, %11 : vector<8x8xf32>
    %13 = math.exp %12 : vector<8x8xf32>
    %cst_9 = arith.constant dense<0.000000e+00> : vector<8xf32>
    %14 = vector.multi_reduction <add>, %13, %cst_9 [0] : vector<8x8xf32> to vector<8xf32>
    %15 = vector.shape_cast %14 : vector<8xf32> to vector<1x8xf32>
    %cst_10 = arith.constant 1.000000e+00 : f32
    %16 = vector.broadcast %cst_10 : f32 to vector<1x8xf32>
    %17 = arith.divf %16, %15 : vector<1x8xf32>
    %18 = vector.broadcast %17 : vector<1x8xf32> to vector<8x8xf32>
    %19 = arith.mulf %13, %18 : vector<8x8xf32>
    %cst_11 = arith.constant dense<0.000000e+00> : vector<8x32xf32>
    %20 = tpu.matmul %19, %2, %cst_11 {dimension_numbers = #tpu.dot_dimension_numbers<[0], [0], [1], [1], [0, 1, 1, 1], [], []>} : vector<8x8xf32>, vector<8x32xf32>, vector<8x32xf32> -> vector<8x32xf32>
    %c0_12 = arith.constant 0 : index
    %c0_13 = arith.constant 0 : index
    %c0_14 = arith.constant 0 : index
    %21 = vector.load %arg5[%c0_12, %c0_13, %c0_14] : memref<1x8x32xf32, #tpu.memory_space<vmem>>, vector<1x8x32xf32>
    %22 = vector.shape_cast %21 : vector<1x8x32xf32> to vector<8x32xf32>
    %23 = vector.shape_cast %20 : vector<8x32xf32> to vector<1x8x32xf32>
    tpu.vector_store %arg5[%c0_12, %c0_13, %c0_14], %23 {strides = array<i32>} : memref<1x8x32xf32, #tpu.memory_space<vmem>>, vector<1x8x32xf32>,
    return
  }
  func.func @transform_0(%arg0: i32, %arg1: i32) -> (i32, i32, i32) {
    %c0_i32 = arith.constant 0 : i32
    %c0_i32_0 = arith.constant 0 : i32
    return %arg0, %arg1, %c0_i32 : i32, i32, i32
  }
  func.func @transform_1(%arg0: i32, %arg1: i32) -> (i32, i32) {
    %c0_i32 = arith.constant 0 : i32
    %c0_i32_0 = arith.constant 0 : i32
    %c0_i32_1 = arith.constant 0 : i32
    return %c0_i32, %c0_i32_0 : i32, i32
  }
  func.func @transform_2(%arg0: i32, %arg1: i32) -> (i32, i32, i32) {
    %c0_i32 = arith.constant 0 : i32
    %c0_i32_0 = arith.constant 0 : i32
    return %arg0, %c0_i32, %arg1 : i32, i32, i32
  }
  func.func @transform_3(%arg0: i32, %arg1: i32) -> (i32, i32, i32) {
    %c0_i32 = arith.constant 0 : i32
    %c0_i32_0 = arith.constant 0 : i32
    return %arg0, %arg1, %c0_i32 : i32, i32, i32
  }
}

</mosaic_0001>

<bundles_post_ra>
// kernel: tpu_custom_call.1
= control target key start
LH: loop header
LB: loop body
LE: loop exit
PB: predicated region body
PF: predicated region fallthrough
CT: control target
= control target key end

     0   :  { %8 = vsyncpa [#allocation3], 0  ;;  %s1177_s0 = inlined_call_operand.hbm [shape: f32[2,8,32], index: 0, kind: input, shape index: {}]   ;;  %s1178_s1 = inlined_call_operand.hbm [shape: f32[8,32], index: 1, kind: input, shape index: {}]   ;;  %s1179_s2 = inlined_call_operand.hbm [shape: f32[2,8,8], index: 2, kind: input, shape index: {}]   ;;  %s1180_s3 = inlined_call_operand.hbm [shape: f32[2,8,32], index: 3, kind: output, shape index: {}]  }
   0x1   :  { %10 = vsyncpa [#allocation3 + $0x1], 0 }
   0x2   :  { %11 = vsyncpa [#allocation6], 0 }
   0x3   :  { %12 = vsyncpa [#allocation4], 0 }
   0x4   :  { %14 = vsyncpa [#allocation4 + $0x1], 0  ;;  %s911_s12 = smov 0   ;;  %s913_s13 = smov 0  }
   0x5   :  { %s915_s14 = smov 0   ;;  %s917_s15 = smov 0  }
   0x6   :  { %s919_s16 = smov 0   ;;  %s921_s17 = smov 0  }
   0x7 LB: > { %s32_s18 = sadd.s32 1, %s879_s16  ;;  %s41_s19 = sadd.s32 1, %s871_s14  ;;  %s883_s17 = sphi %s921_s17, %s20_s17   ;;  %s879_s16 = sphi %s919_s16, %s1206_s16   ;;  %s875_s15 = sphi %s917_s15, %s1205_s15   ;;  %s871_s14 = sphi %s915_s14, %s1204_s14   ;;  %s867_s13 = sphi %s913_s13, %s1203_s13   ;;  %s863_s12 = sphi %s911_s12, %s1202_s12  }
   0x8   : > { %p34_p0 = scmp.ge.s32.totalorder %s32_s18, 2  ;;  %p48_p1 = scmp.ne.s32.totalorder %s871_s14, %s867_s13 }
   0x9   : > { %p49_p2 = scmp.eq.s32.totalorder %s883_s17, 0  ;;  %p647_p5 = scmp.lt.s32.totalorder %s883_s17, 2 }
   0xa   : > { %s1208_s18 = smov (%p34_p0, %s32_s18), 0  ;;  %s166_s21 = sand.u32 1, %s883_s17  }
   0xb   : > { %p50_p4 = por %p49_p2, %p48_p1  ;;  %s36_s20 = ssub.s32 %s879_s16, %s1208_s18 }
   0xc   : > { %p39_p6 = scmp.eq.s32.totalorder %s36_s20, 0  ;;  %s168_s22 = sand.u32 1, %s871_s14  }
   0xd   : > { %s592_s23 = sshll.u32 %s879_s16, 7  ;;  %s961_s25 = sshll.u32 %s168_s22, 3 }
   0xe   : > { %s959_s24 = scalar_select %p39_p6, %s871_s14, %s41_s19  }
   0xf   : > { %s968_s28 = scalar_lea.hbm %s1177_s0, %s592_s23  ;;  %p970_p7 = pnand %p647_p5, %p50_p4 }
  0x10   : > { %s170_s30 = scalar_lea.vmem [#allocation2], %s961_s25  ;;  %s977_s5 = scalar_lea.sflag [#allocation3], %s166_s21 }
  0x11   : > { %s178_s4 = sshll.u32 %s170_s30, 4  ;;  %s705_s6 = scalar_lea.hbm %s968_s28, 128  ;;  %s975_s4 = int_to_ptr.vmem [resolvable:$true] %s178_s4 }
  0x12   : > { %p706_p8 = scmp.ne.s32.totalorder %s968_s28, %s705_s6  ;;  %p707_p9 = pneg %p970_p7 }
  0x13   : > { %s710_s9 = scalar_lea.hbm %s1177_s0, 256  ;;  %p711_p12 = scmp.lt.u32.totalorder %s968_s28, %s1177_s0 }
  0x14   : > { %p708_p10 = pnand %p707_p9, %p706_p8  ;;  %p712_p13 = scmp.lt.u32.totalorder %s710_s9, %s705_s6 }
  0x15   : > { %p714_p2 = scmp.lt.u32.totalorder %s705_s6, %s968_s28 }
  0x16   : > { %p709_p11 = pneg %p708_p10  ;;  %p713_p0 = por %p712_p13, %p711_p12 }
  0x18   : > { %p715_p4 = por %p714_p2, %p713_p0 }
  0x1a   : > { %p716_p5 = pnand %p715_p4, %p709_p11 }
  0x1c   : > { %719 = shalt.err (!%p716_p5)
}
  0x1d   : > { %s720_s19 = scalar_lea.vmem %s975_s4, 128  ;;  %s885_s20 = smov [#allocation2]  }
  0x1e   : > { %p721_p6 = scmp.ne.s32.totalorder %s975_s4, %s720_s19  ;;  %s725_s21 = sshll.u32 %s885_s20, 4  ;;  %s726_s21 = int_to_ptr.vmem [resolvable:$false] %s725_s21 }
  0x1f   : > { %s727_s22 = scalar_lea.vmem %s726_s21, 256  ;;  %p728_p3 = scmp.lt.s32.totalorder %s975_s4, %s726_s21 }
  0x20   : > { %p723_p8 = pnand %p721_p6, %p707_p9  ;;  %p729_p12 = scmp.lt.s32.totalorder %s727_s22, %s720_s19 }
  0x22   : > { %p724_p10 = pneg %p723_p8  ;;  %p730_p13 = por %p729_p12, %p728_p3 }
  0x24   : > { %p731_p0 = pnand %p730_p13, %p724_p10 }
  0x26   : > { %734 = shalt.err (!%p731_p0)
}
  0x27   : > { %638 = dma.hbm_to_vmem [thread:$0]  (!%p970_p7), %s968_s28, 128, %s975_s4, %s977_s5  }
  0x28   : > { %s1006_s26 = sadd.s32 4294967295, %s883_s17   ;;  %s587_s27 = sadd.s32 4294967294, %s883_s17  }
  0x29   : > { %p54_p3 = scmp.ne.s32.totalorder %s867_s13, %s863_s12  ;;  %p1181_p11 = scmp.eq.s32.totalorder %s1006_s26, 0 }
  0x2a   : > { %p129_p2 = scmp.eq.s32.totalorder %s1006_s26, 1  ;;  %p135_p4 = scmp.eq.s32.totalorder %s587_s27, 1 }
  0x2b   : > { %p588_p5 = scmp.ge.s32.totalorder %s883_s17, 1  ;;  %p1016_p6 = por %p1181_p11, %p54_p3 }
  0x2c   : > { %p1023_p8 = por %p129_p2, %p48_p1  ;;  %p1027_p10 = por %p135_p4, %p54_p3 }
  0x2d   : > { %s1187_s30 = scalar_select %p1016_p6, 1, 0 }
  0x2e   : > { %s1188_s28 = scalar_select %p1023_p8, 1, 0 }
  0x2f   : > { %s1189_s4 = scalar_select %p1027_p10, 1, 0 }
  0x30   : > { %p142_p12 = scmp.lt.s32.totalorder %s883_s17, 3  ;;  %s1037_s8 = scalar_lea.hbm %s1179_s2, %s592_s23 }
  0x31   : > { %s886_s10 = smov [#allocation5]   ;;  %s189_s19 = scalar_lea.vmem [#allocation7], %s961_s25 }
  0x32   : > { %p1039_p13 = pnand %p588_p5, %p142_p12  ;;  %s1043_s11 = sshll.u32 %s886_s10, 4  ;;  %s156_s11 = int_to_ptr.vmem [resolvable:$true] %s1043_s11 }
  0x33   : > { %s197_s20 = sshll.u32 %s189_s19, 4  ;;  %s735_s21 = scalar_lea.hbm %s1037_s8, 128  ;;  %s198_s20 = int_to_ptr.vmem [resolvable:$true] %s197_s20 }
  0x34   : > { %s1190_s9 = scalar_select %p1039_p13, 1, 0 }
  0x35   : > { %p736_p0 = scmp.ne.s32.totalorder %s1037_s8, %s735_s21  ;;  %s740_s27 = scalar_lea.hbm %s1179_s2, 256 }
  0x36   : > { %p741_p4 = scmp.lt.u32.totalorder %s1037_s8, %s1179_s2  ;;  %p742_p5 = scmp.lt.u32.totalorder %s740_s27, %s735_s21 }
  0x37   : > { %p738_p3 = pnand %p736_p0, %p707_p9  ;;  %p744_p11 = scmp.lt.u32.totalorder %s735_s21, %s1037_s8 }
  0x38   : > { %p743_p12 = por %p742_p5, %p741_p4 }
  0x39   : > { %p739_p2 = pneg %p738_p3 }
  0x3a   : > { %p745_p10 = por %p744_p11, %p743_p12 }
  0x3c   : > { %p746_p1 = pnand %p745_p10, %p739_p2 }
  0x3e   : > { %749 = shalt.err (!%p746_p1)
}
  0x3f   : > { %s750_s25 = scalar_lea.vmem %s198_s20, 128  ;;  %s887_s10 = smov [#allocation7]  }
  0x40   : > { %p751_p8 = scmp.ne.s32.totalorder %s198_s20, %s750_s25  ;;  %s755_s19 = sshll.u32 %s887_s10, 4  ;;  %s756_s19 = int_to_ptr.vmem [resolvable:$false] %s755_s19 }
  0x41   : > { %s757_s23 = scalar_lea.vmem %s756_s19, 256  ;;  %p758_p6 = scmp.lt.s32.totalorder %s198_s20, %s756_s19 }
  0x42   : > { %p753_p0 = pnand %p751_p8, %p707_p9  ;;  %p759_p13 = scmp.lt.s32.totalorder %s757_s23, %s750_s25 }
  0x44   : > { %p754_p3 = pneg %p753_p0  ;;  %p760_p4 = por %p759_p13, %p758_p6 }
  0x46   : > { %p761_p5 = pnand %p760_p4, %p754_p3 }
  0x48   : > { %764 = shalt.err (!%p761_p5)
}
  0x49   : > { %641 = dma.hbm_to_vmem [thread:$0]  (!%p970_p7), %s1037_s8, 128, %s198_s20, %s977_s5  }
  0x4a   : > { %p1191_p9 = scmp.eq.s32.totalorder %s1006_s26, 0  ;;  %p1192_p11 = scmp.ne.s32.totalorder %s1190_s9, 0 }
  0x4b   : > { %s765_s6 = scalar_lea.hbm %s1178_s1, 128 }
  0x4c   : > { %p1193_p8 = pneg %p1192_p11  ;;  %p766_p6 = scmp.ne.s32.totalorder %s1178_s1, %s765_s6 }
  0x4d   : > { %p772_p2 = scmp.lt.u32.totalorder %s765_s6, %s1178_s1 }
  0x4e   : > { %p1074_p10 = pnand %p1193_p8, %p1191_p9 }
  0x50   : > { %p767_p13 = pneg %p1074_p10 }
  0x52   : > { %p768_p7 = pnand %p767_p13, %p766_p6 }
  0x54   : > { %p769_p1 = pneg %p768_p7 }
  0x56   : > { %p774_p12 = pnand %p772_p2, %p769_p1 }
  0x58   : > { %777 = shalt.err (!%p774_p12)
}
  0x59   : > { %s778_s20 = scalar_lea.vmem %s156_s11, 128  ;;  %p786_p5 = scmp.lt.s32.totalorder %s156_s11, %s156_s11 }
  0x5a   : > { %p779_p0 = scmp.ne.s32.totalorder %s156_s11, %s778_s20  ;;  %p787_p9 = scmp.lt.s32.totalorder %s778_s20, %s778_s20 }
  0x5c   : > { %p781_p3 = pnand %p779_p0, %p767_p13  ;;  %p788_p8 = por %p787_p9, %p786_p5 }
  0x5e   : > { %p782_p4 = pneg %p781_p3 }
  0x60   : > { %p789_p11 = pnand %p788_p8, %p782_p4 }
  0x62   : > { %792 = shalt.err (!%p789_p11)
}
  0x63   : > { %634 = dma.hbm_to_vmem [thread:$0]  (!%p1074_p10), %s1178_s1, 128, %s156_s11, [#allocation6]  }
  0x64   : > { %p1195_p6 = scmp.ne.s32.totalorder %s1190_s9, 0 }
  0x65   : > { %s208_s19 = sand.u32 (!%p1195_p6), 1, %s1006_s26   ;;  %s210_s23 = sand.u32 (!%p1195_p6), 1, %s867_s13  }
  0x66   : > { %206 = sbr.rel (%p1195_p6) target bundleno = 745 (0x2e9), region = 32  ;;  %s1100_s22 = sshll.u32 (!%p1195_p6), %s210_s23, 3 }
  0x67   : > { %s209_s27 = scalar_lea.sflag (!%p1195_p6), [#allocation3], %s208_s19  ;;  %s212_s6 = scalar_lea.vmem (!%p1195_p6), [#allocation2], %s1100_s22 }
  0x68   : > { %p1196_p11 = scmp.ne.s32.totalorder (!%p1195_p6), %s1187_s30, 0 }
  0x6d   : > { %846 = dma.done.wait (%p1196_p11), %s209_s27, 128  }
  0x6e   : > { %848 = vsyncadd (%p1196_p11), %s209_s27, 4294967168  ;;  %p1197_p10 = scmp.eq.s32.totalorder %s1006_s26, 0 }
  0x70   : > { %850 = dma.done.wait (%p1197_p10), [#allocation6], 128   ;;  %p1198_p13 = pmov %p1197_p10 }
  0x71   : > { %s225_s9 = scalar_lea.vmem [#allocation7], %s1100_s22 }
  0x72   : > { %852 = vsyncadd (%p1198_p13), [#allocation6], 4294967168 }
  0x73   : > { %854 = dma.done.wait (%p1196_p11), %s209_s27, 128  }
  0x74   : > { %856 = vsyncadd (%p1196_p11), %s209_s27, 4294967168  ;;  %v888_v0 = vmov 0.0   ;;  %vm889_vm0 = vmmov 0   ;;  %vm256_vm1 = vcmask 261120   ;;  %v253_v1 = vld [vmem:[%s212_s6] sm:$0xff]  ;;  %v254_v2 = vld [vmem:[#allocation5] sm:$0xff] }
  0x75   : > { %611 = vmatprep.subr.mxu0 %v888_v0  ;;  %613 = vmatprep.mubr.msk.f32.mxu0 %vm889_vm0, %v888_v0  ;;  %v255_v3 = vld [vmem:[%s225_s9] sm:$0xff]  ;;  %vm333_vm2 = vcmask 64512   ;;  %s604_s26 = sshll.u32 %s875_s15, 7  ;;  %s252_s30 = scalar_lea.vmem [#allocation8], %s1100_s22 }
  0x76   : > { %616 = vmatprep.subr.mxu1 %v888_v0  ;;  %618 = vmatprep.mubr.msk.f32.mxu1 %vm889_vm0, %v888_v0  ;;  %s475_s11 = sshll.u32 %s252_s30, 4  ;;  %s1126_s7 = scalar_lea.hbm %s1180_s3, %s604_s26  ;;  %s1128_s11 = int_to_ptr.vmem [resolvable:$true] %s475_s11 }
  0x77   : > { %612 = vmatpush3.xpose.msk.msra.mxu0 %vm256_vm1, %v253_v1  ;;  %617 = vmatpush3.msra.mxu1 %v254_v2  ;;  %s461_s5 = scalar_lea.sflag [#allocation4], %s210_s23  ;;  %s793_s8 = scalar_lea.vmem %s1128_s11, 128 }
  0x78   : > { %p794_p7 = scmp.ne.s32.totalorder %s1128_s11, %s793_s8  ;;  %p1199_p1 = scmp.ne.s32.totalorder %s1188_s28, 0 }
  0x79   : > { %s890_s15 = smov [#allocation8]  }
  0x7a   : > { %614 = vmatmul.mubr.msk.f32.vlgmr.msra.gmra.mrb[0].mxu0 %vm256_vm1, %v254_v2  ;;  %p795_p2 = pnand %p794_p7, %p1199_p1  ;;  %s797_s20 = sshll.u32 %s890_s15, 4  ;;  %s798_s20 = int_to_ptr.vmem [resolvable:$false] %s797_s20 }
  0x7b   : > { %s799_s25 = scalar_lea.vmem %s798_s20, 256  ;;  %p800_p0 = scmp.lt.s32.totalorder %s1128_s11, %s798_s20 }
  0x7c   : > { %p796_p12 = pneg %p795_p2  ;;  %p801_p3 = scmp.lt.s32.totalorder %s799_s25, %s793_s8 }
  0x7e   : > { %p802_p4 = por %p801_p3, %p800_p0 }
  0x80   : > { %p803_p5 = pnand %p802_p4, %p796_p12 }
 0x14d   : > { %v329_v4 = vpop.f32.mrb[0].mxu0 }
 0x14e   : > { %v330_v5 = vadd.f32 %v329_v4, %v255_v3  ;;  %v615_v6 = vpop.f32.mrb[1].mxu0 }
 0x150   : > { %v334_v7 = vsel %vm333_vm2, %v330_v5, -inf }
 0x151   : > { %v335_v8 = vrot.slane %v334_v7, 4 }
 0x153   : > { %v336_v9 = vmax.f32 %v334_v7, %v335_v8 }
 0x155   : > { %v337_v10 = vrot.slane %v336_v9, 2 }
 0x157   : > { %v338_v11 = vmax.f32 %v336_v9, %v337_v10 }
 0x159   : > { %v339_v12 = vrot.slane %v338_v11, 1 }
 0x15b   : > { %v340_v13 = vmax.f32 %v338_v11, %v339_v12 }
 0x15d   : > { %v341_v14 = vsub.f32 %v330_v5, %v340_v13 }
 0x15f   : > { %v342_v15 = vmul.f32 1.442695, %v341_v14 }
 0x161   : > { %701 = vpow2.f32 %v342_v15 }
 0x16b   : > { %v702_v16 = vpop.eup %701 }
 0x16c   : > { %v344_v17 = vsel %vm333_vm2, %v702_v16, 0.0 }
 0x16d   : > { %v345_v18 = vrot.slane %v344_v17, 4 }
 0x16f   : > { %v346_v19 = vadd.f32 %v345_v18, %v344_v17 }
 0x171   : > { %v347_v20 = vrot.slane %v346_v19, 2 }
 0x173   : > { %v348_v21 = vadd.f32 %v347_v20, %v346_v19 }
 0x175   : > { %v349_v22 = vrot.slane %v348_v21, 1 }
 0x177   : > { %v350_v23 = vadd.f32 %v349_v22, %v348_v21 }
 0x179   : > { %703 = vrcp.f32 %v350_v23 }
 0x183   : > { %v704_v24 = vpop.eup %703 }
 0x184   : > { %v353_v25 = vmul.f32 %v704_v24, %v702_v16 }
 0x186   : > { %354 = vxpose.xlu0.b32.start.end [1/1] (short) (narrow) %v353_v25, 8 }
 0x206   : > { %v370_v26 = vpop.trf.xlu0 }
 0x207   : > { %619 = vmatmul.mubr.msk.f32.vlgmr.msra.gmra.mrb[0].mxu1 %vm333_vm2, %v370_v26 }
 0x2da   : > { %v455_v27 = vpop.f32.mrb[0].mxu1 }
 0x2db   : > { %459 = vst.msk [vmem:[%s252_s30] sm:$0xff] %vm256_vm1, %v455_v27  ;;  %v620_v28 = vpop.f32.mrb[1].mxu1 }
 0x2dc   : > { %806 = shalt.err (!%p803_p5)
}
 0x2dd   : > { %s807_s10 = scalar_lea.hbm %s1126_s7, 128  ;;  %s811_s22 = scalar_lea.hbm %s1180_s3, 256 }
 0x2de   : > { %p808_p9 = scmp.ne.s32.totalorder %s1126_s7, %s807_s10  ;;  %p812_p11 = scmp.lt.u32.totalorder %s1126_s7, %s1180_s3 }
 0x2df   : > { %p813_p10 = scmp.lt.u32.totalorder %s811_s22, %s807_s10  ;;  %p815_p7 = scmp.lt.u32.totalorder %s807_s10, %s1126_s7 }
 0x2e0   : > { %p809_p8 = pnand %p808_p9, %p1199_p1 }
 0x2e1   : > { %p814_p13 = por %p813_p10, %p812_p11 }
 0x2e2   : > { %p810_p6 = pneg %p809_p8 }
 0x2e3   : > { %p816_p2 = por %p815_p7, %p814_p13 }
 0x2e5   : > { %p817_p12 = pnand %p816_p2, %p810_p6 }
 0x2e7   : > { %820 = shalt.err (!%p817_p12)
}
 0x2e8   : > { %629 = dma.vmem_to_hbm [thread:$0]  (%p1199_p1), %s1128_s11, 128, %s1126_s7, %s461_s5  }
 0x2e9 PF: > { %s487_s9 = sand.u32 1, %s863_s12   ;;  %p1200_p0 = scmp.ne.s32.totalorder %s1189_s4, 0 }
 0x2ea   : > { %p1201_p3 = scmp.ge.s32.totalorder %s883_s17, 2  ;;  %s488_s26 = scalar_lea.sflag [#allocation4], %s487_s9 }
 0x2ec   : > { %p643_p4 = pnand %p1201_p3, %p1200_p0 }
 0x2ee   : > { %858 = dma.done.wait (!%p643_p4), %s488_s26, 128  }
 0x2ef   : > { %860 = vsyncadd (!%p643_p4), %s488_s26, 4294967168  ;;  %s20_s17 = sadd.s32 1, %s883_s17   ;;  %s1202_s12 = smov %s867_s13 }
 0x2f0   : > { %p17_p5 = scmp.ge.s32.totalorder %s20_s17, 4   ;;  %s1203_s13 = smov %s871_s14 }
 0x2f1   : > { %s1204_s14 = smov %s959_s24  ;;  %s1205_s15 = smov %s879_s16 }
 0x2f2   : > { %s1206_s16 = smov %s1208_s18  ;;  %19 = sbr.rel (!%p17_p5) target bundleno = 7 (0x7), region = 92 }
 0x2f9   :  { %493 = vsyncpa [#allocation3], 1 }
 0x2fa   :  { %495 = vsyncpa [#allocation3 + $0x1], 1 }
 0x2fb   :  { %496 = vsyncpa [#allocation6], 1 }
 0x2fc   :  { %497 = vsyncpa [#allocation4], 1 }
 0x2fd   :  { %499 = vsyncpa [#allocation4 + $0x1], 1 }

</bundles_post_ra>
